<compile_context>
chip_gen: v5e
topology: v5e:2x2
jax: 0.10.0
libtpu: 0.0.40
codegen_flags: <defaults>
</compile_context>

<pallas_src>
import functools

import jax
import jax.numpy as jnp
from jax import lax
from jax.experimental import pallas as pl
from jax.experimental.pallas import tpu as pltpu


def _pe_add_kernel(x_ref, pe_ref, o_ref):
    """Eval mode: out = x + pe (dropout is the identity).

    x_ref/o_ref: (tile_s, B, D); pe_ref: (tile_s, 1, D) -> broadcast over B.
    """
    y = x_ref[...] + pe_ref[...].astype(x_ref.dtype)
    o_ref[...] = y.astype(o_ref.dtype)


def _pe_add_dropout_kernel(x_ref, pe_ref, o_ref, *, p, seed, tile_s, batch, d_model):
    """Training mode: out = inverted_dropout(x + pe, p).

    Randomness is a stateless hash of the global element index and the seed, so
    the mask is deterministic and independent of the tiling / core assignment.
    """
    y = x_ref[...] + pe_ref[...].astype(x_ref.dtype)
    shape = y.shape  # (tile_s, B, D)

    # Global element linear index (uint32, wraps harmlessly for huge tensors).
    row0 = (pl.program_id(0) * tile_s).astype(jnp.uint32)
    rows = lax.broadcasted_iota(jnp.uint32, shape, 0) + row0
    bcol = lax.broadcasted_iota(jnp.uint32, shape, 1)
    dcol = lax.broadcasted_iota(jnp.uint32, shape, 2)
    idx = (rows * jnp.uint32(batch) + bcol) * jnp.uint32(d_model) + dcol

    # lowbias32-style integer hash, seeded.
    seed_mix = (int(seed) * 0x9E3779B9) & 0xFFFFFFFF
    h = idx ^ jnp.uint32(seed_mix)
    h = h ^ (h >> 16)
    h = h * jnp.uint32(0x7FEB352D)
    h = h ^ (h >> 15)
    h = h * jnp.uint32(0x846CA68B)
    h = h ^ (h >> 16)

    # Drop iff h < p * 2^32 (correct to ~2^-32); pure integer compare on VPU.
    threshold = jnp.uint32(min(int(round(p * 4294967296.0)), 4294967295))
    keep = h >= threshold

    scale = jnp.asarray(1.0 / (1.0 - p), dtype=y.dtype)
    o_ref[...] = jnp.where(keep, y * scale, jnp.zeros_like(y)).astype(o_ref.dtype)


def _choose_tile_s(S, B, D, itemsize, target_block_bytes=2 << 20):
    """Sequence-tile size: ~2 MiB x-block, and a grid with >= 2 steps.

    x, out and pe blocks are each double-buffered by the BlockSpec pipeline;
    a ~2 MiB x block keeps the working set well inside the scoped-VMEM default
    on every generation (v5e 16 MiB, v6e 32 MiB, v7x 32/64 MiB).
    """
    row_bytes = max(1, B * D * itemsize)
    tile = max(1, target_block_bytes // row_bytes)
    if S > 1:
        # >= 2 grid steps so v7x's two TensorCores both get work.
        tile = min(tile, pl.cdiv(S, 2))
    tile = min(tile, S)
    if tile >= 8:
        tile = (tile // 8) * 8  # tidy row counts for the DMA engine
    return max(1, tile)


def learnable_positional_encoding(x, pe, *, dropout_p=0.1, training=False, seed=0):
    """x: [S, B, D]; pe: [max_len, 1, D] (learnable parameter). Returns [S, B, D]."""
    S, B, D = x.shape
    max_len = pe.shape[0]
    assert pe.shape == (max_len, 1, D) and max_len >= S
    assert 0.0 <= dropout_p < 1.0

    tile_s = _choose_tile_s(S, B, D, x.dtype.itemsize)
    grid = (pl.cdiv(S, tile_s),)  # ragged last block handled by Pallas masking

    in_specs = [
        pl.BlockSpec((tile_s, B, D), lambda i: (i, 0, 0)),   # x
        pl.BlockSpec((tile_s, 1, D), lambda i: (i, 0, 0)),   # pe (broadcast over B)
    ]
    out_spec = pl.BlockSpec((tile_s, B, D), lambda i: (i, 0, 0))
    out_shape = jax.ShapeDtypeStruct((S, B, D), x.dtype)

    cost = pl.CostEstimate(
        flops=2 * S * B * D,
        transcendentals=0,
        bytes_accessed=(2 * S * B * D) * x.dtype.itemsize + S * D * pe.dtype.itemsize,
    )
    cparams = pltpu.CompilerParams(dimension_semantics=("parallel",))

    if (not training) or dropout_p == 0.0:
        kernel = _pe_add_kernel
    else:
        kernel = functools.partial(
            _pe_add_dropout_kernel,
            p=float(dropout_p), seed=int(seed), tile_s=tile_s, batch=B, d_model=D)

    out = pl.pallas_call(
        kernel,
        out_shape=out_shape,
        grid=grid,
        in_specs=in_specs,
        out_specs=out_spec,
        compiler_params=cparams,
        cost_estimate=cost,
    )(x, pe)
    return out


if __name__ == "__main__":
    # Module config (small, consistent with the forward): d_model=32, max_len=64.
    d_model = 32
    max_len = 64
    seq_len = 8
    batch = 2

    key = jax.random.PRNGKey(0)
    k_pe, k_x = jax.random.split(key)

    # Deterministic parameter init mirroring nn.init.uniform_(pe, -0.02, 0.02).
    pe = jax.random.uniform(
        k_pe, (max_len, 1, d_model), minval=-0.02, maxval=0.02, dtype=jnp.float32)

    # Input: [sequence length, batch size, embed dim]
    x = jax.random.normal(k_x, (seq_len, batch, d_model), dtype=jnp.float32)

    # Eval-mode forward (dropout = identity).
    out = learnable_positional_encoding(x, pe, dropout_p=0.1, training=False)
    out = jax.block_until_ready(out)

    ref = x + pe[:seq_len]
    assert out.shape == (seq_len, batch, d_model)
    assert out.dtype == x.dtype
    assert jnp.allclose(out, ref, atol=1e-6, rtol=1e-6)

    # Training-mode forward (stochastic inverted dropout): kept entries must be
    # exactly (x + pe) / (1 - p); dropped entries must be exactly zero.
    # TODO(synk): dropout mask cannot match PyTorch's RNG stream bit-for-bit.
    p = 0.1
    out_tr = learnable_positional_encoding(x, pe, dropout_p=p, training=True, seed=123)
    out_tr = jax.block_until_ready(out_tr)
    assert out_tr.shape == out.shape and out_tr.dtype == x.dtype
    kept = out_tr != 0.0
    scaled_ref = ref * jnp.float32(1.0 / (1.0 - p))
    assert jnp.allclose(jnp.where(kept, out_tr, 0.0),
                        jnp.where(kept, scaled_ref, 0.0), atol=1e-5, rtol=1e-5)

    print("KERNEL_OK")
</pallas_src>

<mosaic_0001>
module attributes {stable_mosaic.version = 11 : i64} {
  func.func @_pe_add_kernel(%arg0: i32, %arg1: memref<4x2x32xf32, #tpu.memory_space<vmem>>, %arg2: memref<4x1x32xf32, #tpu.memory_space<vmem>>, %arg3: memref<4x2x32xf32, #tpu.memory_space<vmem>>) attributes {dimension_semantics = [#tpu.dimension_semantics<parallel>], iteration_bounds = array<i64: 2>, scalar_prefetch = 0 : i64, scratch_operands = 0 : i64, tpu.core_type = #tpu.core_type<tc>, window_params = [{transform_indices = @transform_0, window_bounds = array<i64: 4, 2, 32>}, {transform_indices = @transform_1, window_bounds = array<i64: 4, 1, 32>}, {transform_indices = @transform_2, window_bounds = array<i64: 4, 2, 32>}]} {
    %c0 = arith.constant 0 : index
    %c0_0 = arith.constant 0 : index
    %c0_1 = arith.constant 0 : index
    %0 = vector.load %arg1[%c0, %c0_0, %c0_1] : memref<4x2x32xf32, #tpu.memory_space<vmem>>, vector<4x2x32xf32>
    %c0_2 = arith.constant 0 : index
    %c0_3 = arith.constant 0 : index
    %c0_4 = arith.constant 0 : index
    %1 = vector.load %arg2[%c0_2, %c0_3, %c0_4] : memref<4x1x32xf32, #tpu.memory_space<vmem>>, vector<4x1x32xf32>
    %2 = vector.broadcast %1 : vector<4x1x32xf32> to vector<4x2x32xf32>
    %3 = arith.addf %0, %2 : vector<4x2x32xf32>
    %c0_5 = arith.constant 0 : index
    %c0_6 = arith.constant 0 : index
    %c0_7 = arith.constant 0 : index
    %4 = vector.load %arg3[%c0_5, %c0_6, %c0_7] : memref<4x2x32xf32, #tpu.memory_space<vmem>>, vector<4x2x32xf32>
    tpu.vector_store %arg3[%c0_5, %c0_6, %c0_7], %3 {strides = array<i32>} : memref<4x2x32xf32, #tpu.memory_space<vmem>>, vector<4x2x32xf32>,
    return
  }
  func.func @transform_0(%arg0: i32) -> (i32, i32, i32) {
    %c0_i32 = arith.constant 0 : i32
    %c0_i32_0 = arith.constant 0 : i32
    %c0_i32_1 = arith.constant 0 : i32
    return %arg0, %c0_i32, %c0_i32_0 : i32, i32, i32
  }
  func.func @transform_1(%arg0: i32) -> (i32, i32, i32) {
    %c0_i32 = arith.constant 0 : i32
    %c0_i32_0 = arith.constant 0 : i32
    %c0_i32_1 = arith.constant 0 : i32
    return %arg0, %c0_i32, %c0_i32_0 : i32, i32, i32
  }
  func.func @transform_2(%arg0: i32) -> (i32, i32, i32) {
    %c0_i32 = arith.constant 0 : i32
    %c0_i32_0 = arith.constant 0 : i32
    %c0_i32_1 = arith.constant 0 : i32
    return %arg0, %c0_i32, %c0_i32_0 : i32, i32, i32
  }
}

</mosaic_0001>

<bundles_post_ra>
// kernel: tpu_custom_call.1
= control target key start
LH: loop header
LB: loop body
LE: loop exit
PB: predicated region body
PF: predicated region fallthrough
CT: control target
= control target key end

     0   :  { %7 = vsyncpa [#allocation3], 0  ;;  %s515_s0 = inlined_call_operand.vmem [shape: f32[8,2,32], index: 0, kind: input, shape index: {}]   ;;  %s516_s1 = inlined_call_operand.vmem [shape: f32[64,1,32], index: 1, kind: input, shape index: {}]   ;;  %s517_s2 = inlined_call_operand.hbm [shape: f32[8,2,32], index: 2, kind: output, shape index: {}]  }
   0x1   :  { %9 = vsyncpa [#allocation3 + $0x1], 0  ;;  %s420_s9 = smov 0   ;;  %s422_s10 = smov 0  }
   0x2   :  { %s424_s11 = smov 0   ;;  %s426_s12 = smov 0  }
   0x3 LB: > { %s441_s13 = sadd.s32 4294967295, %s401_s12   ;;  %s280_s14 = sadd.s32 4294967294, %s401_s12   ;;  %s401_s12 = sphi %s426_s12, %s523_s12   ;;  %s397_s11 = sphi %s424_s11, %s522_s11   ;;  %s393_s10 = sphi %s422_s10, %s521_s10   ;;  %s389_s9 = sphi %s420_s9, %s520_s9  }
   0x4   : > { %s445_s15 = sadd.s32 1, %s401_s12   ;;  %s74_s16 = sadd.s32 1, %s397_s11 }
   0x5   : > { %s71_s17 = ssub.s32 %s401_s12, %s445_s15  ;;  %p84_p0 = scmp.ne.s32.totalorder %s397_s11, %s393_s10 }
   0x6   : > { %p72_p1 = scmp.eq.s32.totalorder %s71_s17, 0  ;;  %p85_p2 = scmp.eq.s32.totalorder %s441_s13, 1 }
   0x7   : > { %p90_p3 = scmp.ne.s32.totalorder %s393_s10, %s389_s9  ;;  %p91_p4 = scmp.eq.s32.totalorder %s280_s14, 1 }
   0x8   : > { %s456_s18 = scalar_select %p72_p1, %s397_s11, %s74_s16  }
   0x9   : > { %p458_p5 = por %p85_p2, %p84_p0  ;;  %p462_p6 = por %p91_p4, %p90_p3 }
   0xa   : > { %p283_p7 = scmp.ge.s32.totalorder %s401_s12, 1  ;;  %p126_p8 = scmp.lt.s32.totalorder %s401_s12, 3 }
   0xc   : > { %p127_p9 = pnand %p283_p7, %p126_p8 }
   0xd   : > { %s149_s21 = sand.u32 (!%p127_p9), 1, %s393_s10   ;;  %s285_s22 = sshll.u32 (!%p127_p9), %s441_s13, 2 }
   0xe   : > { %130 = sbr.rel (%p127_p9) target bundleno = 36 (0x24), region = 28  ;;  %p153_p10 = scmp.lt.s32.totalorder (!%p127_p9), %s285_s22, 7 }
   0xf   : > { %s284_s23 = sshll.u32 (!%p127_p9), %s149_s21, 3  ;;  %p159_p11 = scmp.lt.s32.totalorder (!%p127_p9), %s285_s22, 63 }
  0x10   : > { %s151_s4 = scalar_lea.vmem (!%p127_p9), [#allocation2], %s284_s23  ;;  %s293_s6 = sshll.u32 (!%p127_p9), %s441_s13, 3 }
  0x11   : > { %s206_s5 = sshll.u32 (!%p127_p9), %s151_s4, 4  ;;  %s205_s14 = scalar_lea.hbm (!%p127_p9), %s517_s2, %s293_s6  ;;  %s207_s5 = int_to_ptr.vmem [resolvable:$true] %s206_s5 }
  0x12   : > { %s208_s16 = sshll.u32 (!%p127_p9), %s205_s14, 4  ;;  %s194_s13 = scalar_lea.sflag (!%p127_p9), [#allocation3], %s149_s21  ;;  %s209_s16 = int_to_ptr.hbm [resolvable:$true] %s208_s16 }
  0x13   : > { %s154_s24 = scalar_select %p153_p10, %s285_s22, 7  ;;  %vm188_vm0 = vcmask 254976  }
  0x14   : > { %s525_s22 = smov (!%p159_p11, %s285_s22), 63  ;;  %s353_s17 = sshra.s32 %s209_s16, 4  ;;  %s354_s17 = int_to_ptr.hbm [resolvable:$true] %s353_s17 }
  0x15   : > { %s286_s25 = sshll.u32 %s154_s24, 1  ;;  %s161_s3 = scalar_lea.vmem %s516_s1, %s525_s22 }
  0x16   : > { %s156_s28 = scalar_lea.vmem %s515_s0, %s286_s25  ;;  %v335_v1 = vld [vmem:[%s161_s3] ss:$0 sm:$0xff]  ;;  %v336_v4 = vld [vmem:[%s161_s3 + $0x1] ss:$0 sm:$0xff]  ;;  %v337_v6 = vld [vmem:[%s161_s3 + $0x2] ss:$0 sm:$0xff]  ;;  %p360_p1 = scmp.lt.s32.totalorder %s354_s17, %s517_s2 }
  0x17   : > { %v164_v0 = vld [vmem:[%s156_s28] sm:$0x3]  ;;  %v165_v2 = vld [vmem:[%s156_s28 + $0x2] sm:$0x3]  ;;  %v166_v5 = vld [vmem:[%s156_s28 + $0x4] sm:$0x3] }
  0x18   : > { %v184_v3 = vadd.f32 %v335_v1, %v164_v0  ;;  %v167_v7 = vld [vmem:[%s156_s28 + $0x6] sm:$0x3]  ;;  %v185_v8 = vadd.f32 %v336_v4, %v165_v2  ;;  %v338_v9 = vld [vmem:[%s161_s3 + $0x3] ss:$0 sm:$0xff]  ;;  %v186_v10 = vadd.f32 %v337_v6, %v166_v5  ;;  %s355_s22 = scalar_lea.hbm %s354_s17, 8  ;;  %s359_s25 = scalar_lea.hbm %s517_s2, 16 }
  0x19   : > { %v187_v11 = vadd.f32 %v338_v9, %v167_v7  ;;  %p356_p12 = scmp.ne.s32.totalorder %s354_s17, %s355_s22  ;;  %p361_p2 = scmp.lt.s32.totalorder %s359_s25, %s355_s22 }
  0x1a   : > { %189 = vst.msk [vmem:[%s151_s4] sm:$0x3] %vm188_vm0, %v184_v3 }
  0x1b   : > { %190 = vst.msk [vmem:[%s151_s4 + $0x2] sm:$0x3] %vm188_vm0, %v185_v8  ;;  %p357_p13 = pnand %p356_p12, %p458_p5  ;;  %p362_p3 = por %p361_p2, %p360_p1 }
  0x1c   : > { %191 = vst.msk [vmem:[%s151_s4 + $0x4] sm:$0x3] %vm188_vm0, %v186_v10 }
  0x1d   : > { %192 = vst.msk [vmem:[%s151_s4 + $0x6] sm:$0x3] %vm188_vm0, %v187_v11  ;;  %p358_p0 = pneg %p357_p13 }
  0x1f   : > { %p363_p4 = pnand %p362_p3, %p358_p0 }
  0x21   : > { %366 = shalt.err (!%p363_p4)
}
  0x22   : > { %s403_s21 = smov 32   ;;  %s404_s28 = smov 2  }
  0x23   : > { %294 = dma.vmem_to_hbm [thread:$0]  (%p458_p5), %s207_s5, 128, %s209_s16, %s194_s13, %s403_s21, %s403_s21, %s404_s28  }
  0x24 PF: > { %p300_p7 = scmp.ge.s32.totalorder %s401_s12, 2  ;;  %s223_s29 = sand.u32 1, %s389_s9  }
  0x25   : > { %s224_s30 = scalar_lea.sflag [#allocation3], %s223_s29 }
  0x26   : > { %p297_p8 = pnand %p300_p7, %p462_p6 }
  0x28   : > { %p298_p9 = pneg %p297_p8 }
  0x2a   : > { %384 = dma.done.wait (%p298_p9), %s224_s30, 128  }
  0x2b   : > { %386 = vsyncadd (%p298_p9), %s224_s30, 4294967168  ;;  %p12_p10 = scmp.ge.s32.totalorder %s445_s15, 4   ;;  %s520_s9 = smov %s393_s10 }
  0x2c   : > { %s521_s10 = smov %s397_s11  ;;  %s522_s11 = smov %s456_s18 }
  0x2d   : > { %s523_s12 = smov %s445_s15  ;;  %14 = sbr.rel (!%p12_p10) target bundleno = 3 (0x3), region = 66 }
  0x32   :  { %230 = vsyncpa [#allocation3], 1 }
  0x33   :  { %232 = vsyncpa [#allocation3 + $0x1], 1 }

</bundles_post_ra>
